<compile_context>
chip_gen: v6e
topology: v6e:2x2x1
jax: 0.10.0
libtpu: 0.0.40
codegen_flags: <defaults>
</compile_context>

<pallas_src>
import math
import functools

import jax
import jax.numpy as jnp
from jax.experimental import pallas as pl
from jax.experimental.pallas import tpu as pltpu


# -----------------------------------------------------------------------------
# Kernel 1 (module side effect): L1-normalize entity rows [:-1], row-tiled.
# -----------------------------------------------------------------------------
def _entity_norm_kernel(e_count, row_block, e_ref, o_ref):
    w = e_ref[...]                                          # (R, dim)
    l1 = jnp.sum(jnp.abs(w), axis=1, keepdims=True)         # (R, 1)
    # Padding-row check only on the (R, 1) scale column (not the whole tile).
    row = pl.program_id(0) * row_block + jax.lax.broadcasted_iota(
        jnp.int32, l1.shape, 0)
    scale = jnp.where(row == e_count, 1.0, pl.reciprocal(l1))
    o_ref[...] = w * scale


def normalize_entities(e_emb, e_count, *, row_block=512):
    """Returns the entity table with rows [:-1] L1-normalized (row e_count kept)."""
    # TODO(synk): PyTorch mutates the embedding in place; here we return a new
    # table (input_output_aliases could alias it in place under jit donation).
    E1, dim = e_emb.shape
    row_block = min(row_block, E1)
    spec = pl.BlockSpec((row_block, dim), lambda i: (i, 0))
    return pl.pallas_call(
        functools.partial(_entity_norm_kernel, e_count, row_block),
        out_shape=jax.ShapeDtypeStruct((E1, dim), e_emb.dtype),
        grid=(pl.cdiv(E1, row_block),),
        in_specs=[spec],
        out_specs=spec,
        compiler_params=pltpu.CompilerParams(
            dimension_semantics=("parallel",)),
    )(e_emb)


# -----------------------------------------------------------------------------
# Kernel 2: fused (normalize gathered entity rows) + distance + margin loss.
# One grid step processes TB triplets; outputs are lane-dense (1, TB) rows.
# -----------------------------------------------------------------------------
def _transe_kernel(norm, margin, e_count,
                   pos_idx_ref, neg_idx_ref,                 # (TB, 3) int32
                   ph_ref, pr_ref, pt_ref,                   # pos rows, (TB, dim)
                   nh_ref, nr_ref, nt_ref,                   # neg rows, (TB, dim)
                   pd_ref, nd_ref, ls_ref):                  # each (1, TB) f32
    pos_idx = pos_idx_ref[...]
    neg_idx = neg_idx_ref[...]

    def norm_entity_rows(rows, idx_col):
        # forward() L1-normalizes entity rows; the padding row (== e_count) is
        # left untouched. reciprocal -> EUP slot instead of a VALU divide.
        l1 = jnp.sum(jnp.abs(rows), axis=1, keepdims=True)   # (TB, 1)
        scale = jnp.where(idx_col == e_count, 1.0, pl.reciprocal(l1))
        return rows * scale

    hp = norm_entity_rows(ph_ref[...], pos_idx[:, 0:1])
    tp = norm_entity_rows(pt_ref[...], pos_idx[:, 2:3])
    hn = norm_entity_rows(nh_ref[...], neg_idx[:, 0:1])
    tn = norm_entity_rows(nt_ref[...], neg_idx[:, 2:3])

    dp = hp + pr_ref[...] - tp                               # (TB, dim)
    dn = hn + nr_ref[...] - tn                               # (TB, dim)

    if norm == 1:
        pd = jnp.sum(jnp.abs(dp), axis=1)                    # (TB,)
        nd = jnp.sum(jnp.abs(dn), axis=1)
    else:  # L2
        pd = jnp.sqrt(jnp.sum(dp * dp, axis=1))
        nd = jnp.sqrt(jnp.sum(dn * dn, axis=1))

    # MarginRankingLoss(x1=pos, x2=neg, y=-1, reduction='none')
    #   = max(0, pos - neg + margin)
    ls = jnp.maximum(pd - nd + margin, 0.0)

    pd_ref[...] = pd.reshape(1, -1)                          # lane-dense stores
    nd_ref[...] = nd.reshape(1, -1)
    ls_ref[...] = ls.reshape(1, -1)


@functools.partial(jax.jit,
                   static_argnames=("e_count", "norm", "margin", "block_b"))
def transe_forward(pos_triplets, neg_triplets, e_emb, r_emb, *,
                   e_count, norm, margin, block_b=256):
    B, _ = pos_triplets.shape
    dim = e_emb.shape[1]
    r_count = r_emb.shape[0] - 1

    # Pad the batch to a multiple of the tile with padding-index triplets
    # (their rows are valid table rows; results are sliced off at the end).
    n_tiles = pl.cdiv(B, block_b)
    B_pad = n_tiles * block_b
    pad = B_pad - B
    if pad:
        pad_trip = jnp.tile(jnp.array([[e_count, r_count, e_count]], jnp.int32),
                            (pad, 1))
        pos_p = jnp.concatenate([pos_triplets.astype(jnp.int32), pad_trip], 0)
        neg_p = jnp.concatenate([neg_triplets.astype(jnp.int32), pad_trip], 0)
    else:
        pos_p = pos_triplets.astype(jnp.int32)
        neg_p = neg_triplets.astype(jnp.int32)

    # Dense XLA gathers -> contiguous operand slabs (un-normalized entity rows;
    # normalization of the gathered rows is fused into the kernel, so the full
    # normalized table never makes an HBM round trip on the loss path).
    ph = jnp.take(e_emb, pos_p[:, 0], axis=0)
    pr = jnp.take(r_emb, pos_p[:, 1], axis=0)
    pt = jnp.take(e_emb, pos_p[:, 2], axis=0)
    nh = jnp.take(e_emb, neg_p[:, 0], axis=0)
    nr = jnp.take(r_emb, neg_p[:, 1], axis=0)
    nt = jnp.take(e_emb, neg_p[:, 2], axis=0)

    idx_spec = pl.BlockSpec((block_b, 3), lambda i: (i, 0))
    emb_spec = pl.BlockSpec((block_b, dim), lambda i: (i, 0))
    out_spec = pl.BlockSpec((1, block_b), lambda i: (i, 0))
    out_sds = jax.ShapeDtypeStruct((n_tiles, block_b), jnp.float32)

    pd, nd, ls = pl.pallas_call(
        functools.partial(_transe_kernel, norm, margin, e_count),
        out_shape=(out_sds, out_sds, out_sds),
        grid=(n_tiles,),
        in_specs=[idx_spec, idx_spec,
                  emb_spec, emb_spec, emb_spec,
                  emb_spec, emb_spec, emb_spec],
        out_specs=(out_spec, out_spec, out_spec),
        compiler_params=pltpu.CompilerParams(
            dimension_semantics=("parallel",)),   # tiles independent (2 TCs on v7x)
    )(pos_p, neg_p, ph, pr, pt, nh, nr, nt)

    # Module returns (loss, pos_distance, neg_distance), each shape (B,)
    return ls.reshape(-1)[:B], pd.reshape(-1)[:B], nd.reshape(-1)[:B]


# -----------------------------------------------------------------------------
# Pure-JAX reference (mirrors the PyTorch module) for correctness checking.
# -----------------------------------------------------------------------------
def transe_reference(pos, neg, e_emb, r_emb, *, norm, margin):
    l1 = jnp.sum(jnp.abs(e_emb[:-1]), axis=1, keepdims=True)
    e_n = jnp.concatenate([e_emb[:-1] / l1, e_emb[-1:]], axis=0)

    def dist(t):
        d = e_n[t[:, 0]] + r_emb[t[:, 1]] - e_n[t[:, 2]]
        if norm == 1:
            return jnp.sum(jnp.abs(d), axis=1)
        return jnp.sqrt(jnp.sum(d * d, axis=1))

    pd, nd = dist(pos), dist(neg)
    return jnp.maximum(pd - nd + margin, 0.0), pd, nd


if __name__ == "__main__":
    e_count, r_count = 511, 63      # tables get a padding row -> 512 / 64 rows
    dim = 32
    margin = 1.0
    B = 600                         # -> padded to 768 = 3 tiles of 256

    key = jax.random.PRNGKey(0)
    k_e, k_r, k_h, k_rel, k_t, k_h2, k_t2 = jax.random.split(key, 7)

    # Deterministic synthetic init. (The PyTorch module's uniform_(a, a) is a
    # degenerate constant init; we use a symmetric uniform with the same bound
    # so the kernel computes something non-trivial.)
    bound = 6.0 / math.sqrt(dim)
    e_emb = jax.random.uniform(k_e, (e_count + 1, dim), jnp.float32,
                               minval=-bound, maxval=bound)
    r_emb = jax.random.uniform(k_r, (r_count + 1, dim), jnp.float32,
                               minval=-bound, maxval=bound)
    # init_relation(): L1-normalize relation rows [:-1] once at construction.
    r_l1 = jnp.sum(jnp.abs(r_emb[:-1]), axis=1, keepdims=True)
    r_emb = jnp.concatenate([r_emb[:-1] / r_l1, r_emb[-1:]], axis=0)

    heads = jax.random.randint(k_h, (B,), 0, e_count)
    rels = jax.random.randint(k_rel, (B,), 0, r_count)
    tails = jax.random.randint(k_t, (B,), 0, e_count)
    pos_triplets = jnp.stack([heads, rels, tails], axis=1).astype(jnp.int32)

    neg_heads = jax.random.randint(k_h2, (B,), 0, e_count)
    neg_tails = jax.random.randint(k_t2, (B,), 0, e_count)
    neg_triplets = jnp.stack([neg_heads, rels, neg_tails], axis=1).astype(jnp.int32)

    # Persistent entity-table normalization (the module's in-place side effect),
    # exercised and verified separately from the fused loss path.
    e_norm_tbl = normalize_entities(e_emb, e_count, row_block=256)
    jax.block_until_ready(e_norm_tbl)
    ref_tbl = jnp.concatenate(
        [e_emb[:-1] / jnp.sum(jnp.abs(e_emb[:-1]), axis=1, keepdims=True),
         e_emb[-1:]], axis=0)
    assert jnp.allclose(e_norm_tbl, ref_tbl, rtol=1e-5, atol=1e-6)

    for norm in (1, 2):
        loss, pos_d, neg_d = transe_forward(
            pos_triplets, neg_triplets, e_emb, r_emb,
            e_count=e_count, norm=norm, margin=margin, block_b=256)
        jax.block_until_ready((loss, pos_d, neg_d))

        ref_loss, ref_pd, ref_nd = transe_reference(
            pos_triplets, neg_triplets, e_emb, r_emb, norm=norm, margin=margin)

        assert jnp.allclose(pos_d, ref_pd, rtol=1e-5, atol=1e-5)
        assert jnp.allclose(neg_d, ref_nd, rtol=1e-5, atol=1e-5)
        assert jnp.allclose(loss, ref_loss, rtol=1e-5, atol=1e-5)

    print("KERNEL_OK")
</pallas_src>

<mosaic_0001>
module attributes {stable_mosaic.version = 11 : i64} {
  func.func @_entity_norm_kernel(%arg0: i32, %arg1: memref<256x32xf32, #tpu.memory_space<vmem>>, %arg2: memref<256x32xf32, #tpu.memory_space<vmem>>) attributes {dimension_semantics = [#tpu.dimension_semantics<parallel>], iteration_bounds = array<i64: 2>, scalar_prefetch = 0 : i64, scratch_operands = 0 : i64, tpu.core_type = #tpu.core_type<tc>, window_params = [{transform_indices = @transform_0, window_bounds = array<i64: 256, 32>}, {transform_indices = @transform_1, window_bounds = array<i64: 256, 32>}]} {
    %c0 = arith.constant 0 : index
    %c0_0 = arith.constant 0 : index
    %0 = vector.load %arg1[%c0, %c0_0] : memref<256x32xf32, #tpu.memory_space<vmem>>, vector<256x32xf32>
    %1 = math.absf %0 : vector<256x32xf32>
    %cst = arith.constant dense<0.000000e+00> : vector<256xf32>
    %2 = vector.multi_reduction <add>, %1, %cst [1] : vector<256x32xf32> to vector<256xf32>
    %3 = vector.shape_cast %2 : vector<256xf32> to vector<256x1xf32>
    %c256_i32 = arith.constant 256 : i32
    %4 = arith.muli %arg0, %c256_i32 : i32
    %5 = tpu.iota {dimensions = array<i32: 0>} : vector<256x1xi32>
    %6 = vector.broadcast %4 : i32 to vector<256x1xi32>
    %7 = arith.addi %6, %5 : vector<256x1xi32>
    %c511_i32 = arith.constant 511 : i32
    %8 = vector.broadcast %c511_i32 : i32 to vector<256x1xi32>
    %9 = arith.cmpi eq, %7, %8 : vector<256x1xi32>
    %10 = tpu.reciprocal %3 : vector<256x1xf32> -> vector<256x1xf32>
    %cst_1 = arith.constant 1.000000e+00 : f32
    %11 = vector.broadcast %cst_1 : f32 to vector<256x1xf32>
    %12 = arith.select %9, %11, %10 : vector<256x1xi1>, vector<256x1xf32>
    %13 = vector.broadcast %12 : vector<256x1xf32> to vector<256x32xf32>
    %14 = arith.mulf %0, %13 : vector<256x32xf32>
    %c0_2 = arith.constant 0 : index
    %c0_3 = arith.constant 0 : index
    %15 = vector.load %arg2[%c0_2, %c0_3] : memref<256x32xf32, #tpu.memory_space<vmem>>, vector<256x32xf32>
    tpu.vector_store %arg2[%c0_2, %c0_3], %14 {strides = array<i32>} : memref<256x32xf32, #tpu.memory_space<vmem>>, vector<256x32xf32>,
    return
  }
  func.func @transform_0(%arg0: i32) -> (i32, i32) {
    %c0_i32 = arith.constant 0 : i32
    %c0_i32_0 = arith.constant 0 : i32
    return %arg0, %c0_i32 : i32, i32
  }
  func.func @transform_1(%arg0: i32) -> (i32, i32) {
    %c0_i32 = arith.constant 0 : i32
    %c0_i32_0 = arith.constant 0 : i32
    return %arg0, %c0_i32 : i32, i32
  }
}

</mosaic_0001>

<bundles_post_ra>
// kernel: tpu_custom_call.1
= control target key start
LH: loop header
LB: loop body
LE: loop exit
PB: predicated region body
PF: predicated region fallthrough
CT: control target
= control target key end

     0   :  { %s666_s6 = smov 0   ;;  %s1034_s0 = inlined_call_operand.vmem [shape: f32[512,32], index: 0, kind: input, shape index: {}]   ;;  %s1035_s1 = inlined_call_operand.vmem [shape: f32[512,32], index: 1, kind: output, shape index: {}]  }
   0x1 LB: > { %s564_s7 = sadd.s32 4294967295, %s654_s6   ;;  %p568_p0 = scmp.ge.s32.totalorder %s654_s6, 1  ;;  %s654_s6 = sphi %s666_s6, %s11_s6  }
   0x2   : > { %p88_p1 = scmp.lt.s32.totalorder %s654_s6, 3 }
   0x4   : > { %p89_p2 = pnand %p568_p0, %p88_p1 }
   0x5   : > { %s569_s8 = sshll.u32 (!%p89_p2), %s564_s7, 5  ;;  %s573_s13 = sshll.u32 (!%p89_p2), %s564_s7, 8 }
   0x6   : > { %92 = sbr.rel (%p89_p2) target bundleno = 235 (0xeb), region = 24  ;;  %p109_p3 = scmp.lt.s32.totalorder (!%p89_p2), %s569_s8, 63 }
   0xb   : > { %s1037_s8 = smov (!%p109_p3, %s569_s8), 63  ;;  %vm184_vm0 = vcmask 261120  }
   0xc   : > { %s570_s9 = sshll.u32 %s1037_s8, 3 }
   0xd   : > { %s684_s12 = scalar_lea.vmem %s1034_s0, %s570_s9  ;;  %s867_s16 = scalar_lea.vmem %s1035_s1, %s570_s9 }
   0xe   : > { %v687_v0 = vld [vmem:[%s684_s12 + $0x10] sm:$0xff]  ;;  %v690_v1 = vld [vmem:[%s684_s12] sm:$0xff]  ;;  %v693_v2 = vld [vmem:[%s684_s12 + $0x18] sm:$0xff] }
   0xf   : > { %v154_v3 = vand.u32 2147483647, %v687_v0  ;;  %v152_v4 = vand.u32 2147483647, %v690_v1  ;;  %v155_v5 = vand.u32 2147483647, %v693_v2 }
  0x10   : > { %v699_v6 = vld [vmem:[%s684_s12 + $0x8] sm:$0xff]  ;;  %v705_v8 = vld [vmem:[%s684_s12 + $0x20] sm:$0xff]  ;;  %v715_v16 = vld [vmem:[%s684_s12 + $0x38] sm:$0xff] }
  0x11   : > { %v702_v7 = vld [vmem:[%s684_s12 + $0x28] sm:$0xff]  ;;  %v191_v9 = vsel %vm184_vm0, %v154_v3, 0.0  ;;  %v185_v10 = vsel %vm184_vm0, %v152_v4, 0.0  ;;  %v153_v11 = vand.u32 2147483647, %v699_v6  ;;  %v194_v12 = vsel %vm184_vm0, %v155_v5, 0.0 }
  0x12   : > { %192 = vadd.xlane.f32.xlu1 %v191_v9  ;;  %186 = vadd.xlane.f32.xlu0 %v185_v10  ;;  %v157_v14 = vand.u32 2147483647, %v702_v7  ;;  %v156_v15 = vand.u32 2147483647, %v705_v8  ;;  %v718_v17 = vld [vmem:[%s684_s12 + $0x30] sm:$0xff]  ;;  %v725_v22 = vld [vmem:[%s684_s12 + $0x48] sm:$0xff] }
  0x13   : > { %v188_v13 = vsel %vm184_vm0, %v153_v11, 0.0  ;;  %v159_v20 = vand.u32 2147483647, %v715_v16  ;;  %v158_v21 = vand.u32 2147483647, %v718_v17  ;;  %v728_v23 = vld [vmem:[%s684_s12 + $0x40] sm:$0xff] }
  0x14   : > { %v200_v18 = vsel %vm184_vm0, %v157_v14, 0.0  ;;  %v197_v19 = vsel %vm184_vm0, %v156_v15, 0.0  ;;  %v161_v26 = vand.u32 2147483647, %v725_v22  ;;  %v160_v27 = vand.u32 2147483647, %v728_v23 }
  0x15   : > { %v206_v24 = vsel %vm184_vm0, %v159_v20, 0.0  ;;  %v203_v25 = vsel %vm184_vm0, %v158_v21, 0.0  ;;  %v735_v28 = vld [vmem:[%s684_s12 + $0x58] sm:$0xff]  ;;  %v738_v29 = vld [vmem:[%s684_s12 + $0x50] sm:$0xff]  ;;  %v745_v34 = vld [vmem:[%s684_s12 + $0x68] sm:$0xff] }
  0x16   : > { %195 = vadd.xlane.f32.xlu1 %v194_v12  ;;  %189 = vadd.xlane.f32.xlu0 %v188_v13  ;;  %v212_v30 = vsel %vm184_vm0, %v161_v26, 0.0  ;;  %v209_v31 = vsel %vm184_vm0, %v160_v27, 0.0  ;;  %v163_v32 = vand.u32 2147483647, %v735_v28  ;;  %v162_v33 = vand.u32 2147483647, %v738_v29 }
  0x17   : > { %v748_v35 = vld [vmem:[%s684_s12 + $0x60] sm:$0xff]  ;;  %v165_v38 = vand.u32 2147483647, %v745_v34  ;;  %v755_v40 = vld [vmem:[%s684_s12 + $0x78] sm:$0xff]  ;;  %v758_v41 = vld [vmem:[%s684_s12 + $0x70] sm:$0xff] }
  0x18   : > { %v218_v36 = vsel %vm184_vm0, %v163_v32, 0.0  ;;  %v215_v37 = vsel %vm184_vm0, %v162_v33, 0.0  ;;  %v164_v39 = vand.u32 2147483647, %v748_v35  ;;  %v167_v44 = vand.u32 2147483647, %v755_v40 }
  0x19   : > { %v224_v42 = vsel %vm184_vm0, %v165_v38, 0.0  ;;  %v166_v45 = vand.u32 2147483647, %v758_v41  ;;  %v765_v46 = vld [vmem:[%s684_s12 + $0x88] sm:$0xff]  ;;  %v768_v47 = vld [vmem:[%s684_s12 + $0x80] sm:$0xff]  ;;  %v775_v52 = vld [vmem:[%s684_s12 + $0x98] sm:$0xff] }
  0x1a   : > { %201 = vadd.xlane.f32.xlu1 %v200_v18  ;;  %198 = vadd.xlane.f32.xlu0 %v197_v19  ;;  %v221_v43 = vsel %vm184_vm0, %v164_v39, 0.0  ;;  %v230_v48 = vsel %vm184_vm0, %v167_v44, 0.0  ;;  %v169_v50 = vand.u32 2147483647, %v765_v46  ;;  %v168_v51 = vand.u32 2147483647, %v768_v47 }
  0x1b   : > { %v227_v49 = vsel %vm184_vm0, %v166_v45, 0.0  ;;  %v778_v53 = vld [vmem:[%s684_s12 + $0x90] sm:$0xff]  ;;  %v171_v56 = vand.u32 2147483647, %v775_v52  ;;  %v785_v58 = vld [vmem:[%s684_s12 + $0xa8] sm:$0xff]  ;;  %v788_v59 = vld [vmem:[%s684_s12 + $0xa0] sm:$0xff] }
  0x1c   : > { %v236_v54 = vsel %vm184_vm0, %v169_v50, 0.0  ;;  %v233_v55 = vsel %vm184_vm0, %v168_v51, 0.0  ;;  %v170_v57 = vand.u32 2147483647, %v778_v53  ;;  %v173_v62 = vand.u32 2147483647, %v785_v58 }
  0x1d   : > { %v242_v60 = vsel %vm184_vm0, %v171_v56, 0.0  ;;  %v172_v63 = vand.u32 2147483647, %v788_v59  ;;  %v795_v3 = vld [vmem:[%s684_s12 + $0xb8] sm:$0xff]  ;;  %v798_v4 = vld [vmem:[%s684_s12 + $0xb0] sm:$0xff]  ;;  %v805_v12 = vld [vmem:[%s684_s12 + $0xc8] sm:$0xff]  ;;  %v282_v50 = vlaneseq }
  0x1e   : > { %207 = vadd.xlane.f32.xlu1 %v206_v24  ;;  %204 = vadd.xlane.f32.xlu0 %v203_v25  ;;  %v239_v61 = vsel %vm184_vm0, %v170_v57, 0.0  ;;  %v248_v5 = vsel %vm184_vm0, %v173_v62, 0.0  ;;  %v175_v10 = vand.u32 2147483647, %v795_v3  ;;  %v174_v11 = vand.u32 2147483647, %v798_v4 }
  0x1f   : > { %v245_v9 = vsel %vm184_vm0, %v172_v63, 0.0  ;;  %v808_v13 = vld [vmem:[%s684_s12 + $0xc0] sm:$0xff]  ;;  %v177_v18 = vand.u32 2147483647, %v805_v12  ;;  %v815_v20 = vld [vmem:[%s684_s12 + $0xd8] sm:$0xff]  ;;  %v818_v21 = vld [vmem:[%s684_s12 + $0xd0] sm:$0xff] }
  0x20   : > { %v254_v14 = vsel %vm184_vm0, %v175_v10, 0.0  ;;  %v251_v15 = vsel %vm184_vm0, %v174_v11, 0.0  ;;  %v176_v19 = vand.u32 2147483647, %v808_v13  ;;  %v179_v26 = vand.u32 2147483647, %v815_v20 }
  0x21   : > { %v260_v24 = vsel %vm184_vm0, %v177_v18, 0.0  ;;  %v178_v27 = vand.u32 2147483647, %v818_v21  ;;  %v835_v38 = vld [vmem:[%s684_s12 + $0xf8] sm:$0xff]  ;;  %v838_v39 = vld [vmem:[%s684_s12 + $0xf0] sm:$0xff]  ;;  %v846_v51 = vshrl.u32 %v282_v50, 7 }
  0x22   : > { %213 = vadd.xlane.f32.xlu1 %v212_v30  ;;  %210 = vadd.xlane.f32.xlu0 %v209_v31  ;;  %v257_v25 = vsel %vm184_vm0, %v176_v19, 0.0  ;;  %v825_v30 = vld [vmem:[%s684_s12 + $0xe8] sm:$0xff]  ;;  %v828_v31 = vld [vmem:[%s684_s12 + $0xe0] sm:$0xff]  ;;  %v266_v32 = vsel %vm184_vm0, %v179_v26, 0.0  ;;  %v183_v44 = vand.u32 2147483647, %v835_v38 }
  0x23   : > { %v263_v33 = vsel %vm184_vm0, %v178_v27, 0.0  ;;  %v182_v45 = vand.u32 2147483647, %v838_v39  ;;  %v285_v56 = vadd.s32 16, %v846_v51  ;;  %v286_v62 = vadd.s32 24, %v846_v51 }
  0x24   : > { %v284_v11 = vadd.s32 8, %v846_v51 }
  0x26   : > { %219 = vadd.xlane.f32.xlu1 %v218_v36  ;;  %216 = vadd.xlane.f32.xlu0 %v215_v37  ;;  %v181_v36 = vand.u32 2147483647, %v825_v30  ;;  %v180_v37 = vand.u32 2147483647, %v828_v31 }
  0x2a   : > { %225 = vadd.xlane.f32.xlu1 %v224_v42  ;;  %222 = vadd.xlane.f32.xlu0 %v221_v43  ;;  %v272_v42 = vsel %vm184_vm0, %v181_v36, 0.0  ;;  %v269_v43 = vsel %vm184_vm0, %v180_v37, 0.0 }
  0x2e   : > { %231 = vadd.xlane.f32.xlu1 %v230_v48  ;;  %228 = vadd.xlane.f32.xlu0 %v227_v49  ;;  %v278_v48 = vsel %vm184_vm0, %v183_v44, 0.0  ;;  %v275_v49 = vsel %vm184_vm0, %v182_v45, 0.0 }
  0x32   : > { %237 = vadd.xlane.f32.xlu1 %v236_v54  ;;  %234 = vadd.xlane.f32.xlu0 %v233_v55 }
  0x36   : > { %243 = vadd.xlane.f32.xlu1 %v242_v60  ;;  %240 = vadd.xlane.f32.xlu0 %v239_v61  ;;  %v851_v61 = vstv %s573_s13 }
  0x37   : > { %v318_v63 = vadd.s32 %v851_v61, %v285_v56  ;;  %v316_v10 = vadd.s32 %v851_v61, %v846_v51  ;;  %v292_v56 = vadd.s32 72, %v846_v51 }
  0x39   : > { %vm350_vm1 = vcmp.eq.s32.totalorder %v318_v63, 511  ;;  %vm348_vm2 = vcmp.eq.s32.totalorder %v316_v10, 511 }
  0x3a   : > { %249 = vadd.xlane.f32.xlu1 %v248_v5  ;;  %246 = vadd.xlane.f32.xlu0 %v245_v9 }
  0x3e   : > { %255 = vadd.xlane.f32.xlu1 %v254_v14  ;;  %252 = vadd.xlane.f32.xlu0 %v251_v15  ;;  %v319_v14 = vadd.s32 %v851_v61, %v286_v62  ;;  %v288_v15 = vadd.s32 40, %v846_v51 }
  0x40   : > { %vm351_vm3 = vcmp.eq.s32.totalorder %v319_v14, 511  ;;  %v325_v14 = vadd.s32 %v851_v61, %v292_v56 }
  0x42   : > { %261 = vadd.xlane.f32.xlu1 %v260_v24  ;;  %258 = vadd.xlane.f32.xlu0 %v257_v25  ;;  %v317_v24 = vadd.s32 %v851_v61, %v284_v11  ;;  %v287_v25 = vadd.s32 32, %v846_v51  ;;  %vm357_vm9 = vcmp.eq.s32.totalorder %v325_v14, 511 }
  0x44   : > { %vm349_vm4 = vcmp.eq.s32.totalorder %v317_v24, 511 }
  0x46   : > { %267 = vadd.xlane.f32.xlu1 %v266_v32  ;;  %264 = vadd.xlane.f32.xlu0 %v263_v33  ;;  %v290_v33 = vadd.s32 56, %v846_v51 }
  0x4a   : > { %273 = vadd.xlane.f32.xlu1 %v272_v42  ;;  %270 = vadd.xlane.f32.xlu0 %v269_v43  ;;  %v321_v42 = vadd.s32 %v851_v61, %v288_v15  ;;  %v289_v43 = vadd.s32 48, %v846_v51 }
  0x4c   : > { %vm353_vm5 = vcmp.eq.s32.totalorder %v321_v42, 511 }
  0x4e   : > { %279 = vadd.xlane.f32.xlu1 %v278_v48  ;;  %276 = vadd.xlane.f32.xlu0 %v275_v49  ;;  %v320_v49 = vadd.s32 %v851_v61, %v287_v25 }
  0x50   : > { %vm352_vm6 = vcmp.eq.s32.totalorder %v320_v49, 511 }
  0x9b   : > { %v193_v54 = vpop.xlane.xlu1 %192  ;;  %v187_v55 = vpop.xlane.xlu0 %186 }
  0x9c   : > { %584 = vrcp.f32 %v193_v54 }
  0x9d   : > { %586 = vrcp.f32 %v187_v55  ;;  %v323_v55 = vadd.s32 %v851_v61, %v290_v33 }
  0x9f   : > { %v196_v57 = vpop.xlane.xlu1 %195  ;;  %v190_v60 = vpop.xlane.xlu0 %189  ;;  %vm355_vm7 = vcmp.eq.s32.totalorder %v323_v55, 511  ;;  %v298_v55 = vadd.s32 120, %v846_v51 }
  0xa0   : > { %588 = vrcp.f32 %v196_v57 }
  0xa1   : > { %590 = vrcp.f32 %v190_v60  ;;  %v322_v60 = vadd.s32 %v851_v61, %v289_v43  ;;  %v295_v43 = vadd.s32 96, %v846_v51 }
  0xa3   : > { %v202_v5 = vpop.xlane.xlu1 %201  ;;  %v199_v9 = vpop.xlane.xlu0 %198  ;;  %vm354_vm8 = vcmp.eq.s32.totalorder %v322_v60, 511 }
  0xa4   : > { %592 = vrcp.f32 %v202_v5 }
  0xa5   : > { %594 = vrcp.f32 %v199_v9  ;;  %v291_v9 = vadd.s32 64, %v846_v51 }
  0xa7   : > { %v208_v18 = vpop.xlane.xlu1 %207  ;;  %v205_v19 = vpop.xlane.xlu0 %204 }
  0xa8   : > { %596 = vrcp.f32 %v208_v18  ;;  %v294_v18 = vadd.s32 88, %v846_v51 }
  0xa9   : > { %v585_v26 = vpop.eup %584  ;;  %598 = vrcp.f32 %v205_v19 }
  0xaa   : > { %v587_v27 = vpop.eup %586  ;;  %v414_v32 = vsel %vm350_vm1, 1.0, %v585_v26  ;;  %v324_v26 = vadd.s32 %v851_v61, %v291_v9  ;;  %v327_v42 = vadd.s32 %v851_v61, %v294_v18 }
  0xab   : > { %v446_v36 = vmul.f32 %v414_v32, %v687_v0  ;;  %v412_v37 = vsel %vm348_vm2, 1.0, %v587_v27  ;;  %v214_v44 = vpop.xlane.xlu1 %213  ;;  %v211_v45 = vpop.xlane.xlu0 %210  ;;  %v293_v27 = vadd.s32 80, %v846_v51 }
  0xac   : > { %v444_v48 = vmul.f32 %v412_v37, %v690_v1  ;;  %600 = vrcp.f32 %v214_v44  ;;  %vm356_vm10 = vcmp.eq.s32.totalorder %v324_v26, 511  ;;  %vm359_vm11 = vcmp.eq.s32.totalorder %v327_v42, 511 }
  0xad   : > { %v589_v50 = vpop.eup %588  ;;  %478 = vst.msk [vmem:[%s867_s16 + $0x10] sm:$0xff] %vm184_vm0, %v446_v36  ;;  %602 = vrcp.f32 %v211_v45  ;;  %v296_v36 = vadd.s32 104, %v846_v51  ;;  %v326_v49 = vadd.s32 %v851_v61, %v293_v27  ;;  %v302_v26 = vadd.s32 152, %v846_v51 }
  0xae   : > { %v591_v54 = vpop.eup %590  ;;  %476 = vst.msk [vmem:[%s867_s16] sm:$0xff] %vm184_vm0, %v444_v48  ;;  %v415_v0 = vsel %vm351_vm3, 1.0, %v589_v50 }
  0xaf   : > { %v447_v1 = vmul.f32 %v415_v0, %v693_v2  ;;  %v413_v57 = vsel %vm349_vm4, 1.0, %v591_v54  ;;  %v220_v62 = vpop.xlane.xlu1 %219  ;;  %v217_v63 = vpop.xlane.xlu0 %216  ;;  %v329_v0 = vadd.s32 %v851_v61, %v296_v36  ;;  %vm358_vm12 = vcmp.eq.s32.totalorder %v326_v49, 511 }
  0xb0   : > { %v445_v5 = vmul.f32 %v413_v57, %v699_v6  ;;  %604 = vrcp.f32 %v220_v62 }
  0xb1   : > { %v593_v10 = vpop.eup %592  ;;  %479 = vst.msk [vmem:[%s867_s16 + $0x18] sm:$0xff] %vm184_vm0, %v447_v1  ;;  %606 = vrcp.f32 %v217_v63  ;;  %v328_v1 = vadd.s32 %v851_v61, %v295_v43  ;;  %v297_v63 = vadd.s32 112, %v846_v51  ;;  %vm361_vm13 = vcmp.eq.s32.totalorder %v329_v0, 511 }
  0xb2   : > { %v595_v11 = vpop.eup %594  ;;  %477 = vst.msk [vmem:[%s867_s16 + $0x8] sm:$0xff] %vm184_vm0, %v445_v5  ;;  %v417_v2 = vsel %vm353_vm5, 1.0, %v593_v10  ;;  %v331_v10 = vadd.s32 %v851_v61, %v298_v55  ;;  %v303_v0 = vadd.s32 160, %v846_v51 }
  0xb3   : > { %v449_v15 = vmul.f32 %v417_v2, %v702_v7  ;;  %v416_v6 = vsel %vm352_vm6, 1.0, %v595_v11  ;;  %v226_v19 = vpop.xlane.xlu1 %225  ;;  %v223_v24 = vpop.xlane.xlu0 %222  ;;  %vm360_vm14 = vcmp.eq.s32.totalorder %v328_v1, 511  ;;  %v300_v2 = vadd.s32 136, %v846_v51 }
  0xb4   : > { %v448_v25 = vmul.f32 %v416_v6, %v705_v8  ;;  %608 = vrcp.f32 %v226_v19  ;;  %v330_v18 = vadd.s32 %v851_v61, %v297_v63  ;;  %v299_v19 = vadd.s32 128, %v846_v51 }
  0xb5   : > { %v597_v32 = vpop.eup %596  ;;  %481 = vst.msk [vmem:[%s867_s16 + $0x28] sm:$0xff] %vm184_vm0, %v449_v15  ;;  %610 = vrcp.f32 %v223_v24  ;;  %vm363_vm15 = vcmp.eq.s32.totalorder %v331_v10, 511 }
  0xb6   : > { %v599_v33 = vpop.eup %598  ;;  %480 = vst.msk [vmem:[%s867_s16 + $0x20] sm:$0xff] %vm184_vm0, %v448_v25  ;;  %v419_v7 = vsel %vm355_vm7, 1.0, %v597_v32  ;;  %v333_v32 = vadd.s32 %v851_v61, %v300_v2  ;;  %vm362_vm1 = vcmp.eq.s32.totalorder %v330_v18, 511 }
  0xb7   : > { %v451_v8 = vmul.f32 %v419_v7, %v715_v16  ;;  %v418_v37 = vsel %vm354_vm8, 1.0, %v599_v33  ;;  %v232_v44 = vpop.xlane.xlu1 %231  ;;  %v229_v45 = vpop.xlane.xlu0 %228  ;;  %v301_v33 = vadd.s32 144, %v846_v51 }
  0xb8   : > { %v450_v48 = vmul.f32 %v418_v37, %v718_v17  ;;  %612 = vrcp.f32 %v232_v44  ;;  %v332_v37 = vadd.s32 %v851_v61, %v299_v19  ;;  %v335_v44 = vadd.s32 %v851_v61, %v302_v26 }
  0xb9   : > { %v601_v50 = vpop.eup %600  ;;  %483 = vst.msk [vmem:[%s867_s16 + $0x38] sm:$0xff] %vm184_vm0, %v451_v8  ;;  %614 = vrcp.f32 %v229_v45  ;;  %v304_v45 = vadd.s32 168, %v846_v51  ;;  %vm365_vm2 = vcmp.eq.s32.totalorder %v333_v32, 511  ;;  %v334_v49 = vadd.s32 %v851_v61, %v301_v33 }
  0xba   : > { %v603_v54 = vpop.eup %602  ;;  %482 = vst.msk [vmem:[%s867_s16 + $0x30] sm:$0xff] %vm184_vm0, %v450_v48  ;;  %v421_v16 = vsel %vm357_vm9, 1.0, %v601_v50  ;;  %vm364_vm3 = vcmp.eq.s32.totalorder %v332_v37, 511  ;;  %vm367_vm4 = vcmp.eq.s32.totalorder %v335_v44, 511  ;;  %v310_v26 = vadd.s32 216, %v846_v51 }
  0xbb   : > { %v453_v17 = vmul.f32 %v421_v16, %v725_v22  ;;  %v420_v56 = vsel %vm356_vm10, 1.0, %v603_v54  ;;  %v238_v57 = vpop.xlane.xlu1 %237  ;;  %v235_v60 = vpop.xlane.xlu0 %234  ;;  %vm366_vm5 = vcmp.eq.s32.totalorder %v334_v49, 511  ;;  %v311_v49 = vadd.s32 224, %v846_v51 }
  0xbc   : > { %v452_v62 = vmul.f32 %v420_v56, %v728_v23  ;;  %616 = vrcp.f32 %v238_v57  ;;  %v337_v56 = vadd.s32 %v851_v61, %v304_v45  ;;  %v306_v57 = vadd.s32 184, %v846_v51 }
  0xbd   : > { %v605_v5 = vpop.eup %604  ;;  %485 = vst.msk [vmem:[%s867_s16 + $0x48] sm:$0xff] %vm184_vm0, %v453_v17  ;;  %618 = vrcp.f32 %v235_v60 }
  0xbe   : > { %v607_v9 = vpop.eup %606  ;;  %484 = vst.msk [vmem:[%s867_s16 + $0x40] sm:$0xff] %vm184_vm0, %v452_v62  ;;  %v423_v22 = vsel %vm359_vm11, 1.0, %v605_v5  ;;  %v336_v5 = vadd.s32 %v851_v61, %v303_v0  ;;  %vm369_vm6 = vcmp.eq.s32.totalorder %v337_v56, 511  ;;  %v339_v2 = vadd.s32 %v851_v61, %v306_v57 }
  0xbf   : > { %v455_v11 = vmul.f32 %v423_v22, %v735_v28  ;;  %v422_v23 = vsel %vm358_vm12, 1.0, %v607_v9  ;;  %v244_v14 = vpop.xlane.xlu1 %243  ;;  %v241_v15 = vpop.xlane.xlu0 %240  ;;  %v305_v9 = vadd.s32 176, %v846_v51  ;;  %v313_v56 = vadd.s32 240, %v846_v51 }
  0xc0   : > { %v454_v6 = vmul.f32 %v422_v23, %v738_v29  ;;  %620 = vrcp.f32 %v244_v14  ;;  %v307_v14 = vadd.s32 192, %v846_v51  ;;  %vm368_vm7 = vcmp.eq.s32.totalorder %v336_v5, 511 }
  0xc1   : > { %v609_v24 = vpop.eup %608  ;;  %487 = vst.msk [vmem:[%s867_s16 + $0x58] sm:$0xff] %vm184_vm0, %v455_v11  ;;  %622 = vrcp.f32 %v241_v15  ;;  %v308_v11 = vadd.s32 200, %v846_v51  ;;  %v338_v19 = vadd.s32 %v851_v61, %v305_v9  ;;  %vm371_vm8 = vcmp.eq.s32.totalorder %v339_v2, 511 }
  0xc2   : > { %v611_v25 = vpop.eup %610  ;;  %486 = vst.msk [vmem:[%s867_s16 + $0x50] sm:$0xff] %vm184_vm0, %v454_v6  ;;  %v425_v28 = vsel %vm361_vm13, 1.0, %v609_v24 }
  0xc3   : > { %v457_v29 = vmul.f32 %v425_v28, %v745_v34  ;;  %v424_v27 = vsel %vm360_vm14, 1.0, %v611_v25  ;;  %v250_v7 = vpop.xlane.xlu1 %249  ;;  %v247_v36 = vpop.xlane.xlu0 %246  ;;  %v341_v28 = vadd.s32 %v851_v61, %v308_v11  ;;  %vm370_vm9 = vcmp.eq.s32.totalorder %v338_v19, 511 }
  0xc4   : > { %v456_v8 = vmul.f32 %v424_v27, %v748_v35  ;;  %624 = vrcp.f32 %v250_v7  ;;  %v340_v27 = vadd.s32 %v851_v61, %v307_v14 }
  0xc5   : > { %v613_v42 = vpop.eup %612  ;;  %489 = vst.msk [vmem:[%s867_s16 + $0x68] sm:$0xff] %vm184_vm0, %v457_v29  ;;  %626 = vrcp.f32 %v247_v36  ;;  %v309_v36 = vadd.s32 208, %v846_v51  ;;  %vm373_vm10 = vcmp.eq.s32.totalorder %v341_v28, 511 }
  0xc6   : > { %v615_v43 = vpop.eup %614  ;;  %488 = vst.msk [vmem:[%s867_s16 + $0x60] sm:$0xff] %vm184_vm0, %v456_v8  ;;  %v427_v34 = vsel %vm363_vm15, 1.0, %v613_v42  ;;  %v343_v42 = vadd.s32 %v851_v61, %v310_v26  ;;  %vm372_vm11 = vcmp.eq.s32.totalorder %v340_v27, 511 }
  0xc7   : > { %v459_v35 = vmul.f32 %v427_v34, %v755_v40  ;;  %v426_v48 = vsel %vm362_vm1, 1.0, %v615_v43  ;;  %v256_v50 = vpop.xlane.xlu1 %255  ;;  %v253_v54 = vpop.xlane.xlu0 %252  ;;  %v312_v34 = vadd.s32 232, %v846_v51 }
  0xc8   : > { %v458_v16 = vmul.f32 %v426_v48, %v758_v41  ;;  %628 = vrcp.f32 %v256_v50  ;;  %v342_v48 = vadd.s32 %v851_v61, %v309_v36  ;;  %vm375_vm12 = vcmp.eq.s32.totalorder %v343_v42, 511 }
  0xc9   : > { %v617_v55 = vpop.eup %616  ;;  %491 = vst.msk [vmem:[%s867_s16 + $0x78] sm:$0xff] %vm184_vm0, %v459_v35  ;;  %630 = vrcp.f32 %v253_v54  ;;  %v345_v0 = vadd.s32 %v851_v61, %v312_v34 }
  0xca   : > { %v619_v17 = vpop.eup %618  ;;  %490 = vst.msk [vmem:[%s867_s16 + $0x70] sm:$0xff] %vm184_vm0, %v458_v16  ;;  %v429_v40 = vsel %vm365_vm2, 1.0, %v617_v55  ;;  %v314_v55 = vadd.s32 248, %v846_v51  ;;  %vm374_vm13 = vcmp.eq.s32.totalorder %v342_v48, 511  ;;  %v346_v51 = vadd.s32 %v851_v61, %v313_v56 }
  0xcb   : > { %v461_v1 = vmul.f32 %v429_v40, %v765_v46  ;;  %v428_v41 = vsel %vm364_vm3, 1.0, %v619_v17  ;;  %v262_v60 = vpop.xlane.xlu1 %261  ;;  %v259_v62 = vpop.xlane.xlu0 %258  ;;  %v344_v40 = vadd.s32 %v851_v61, %v311_v49  ;;  %vm377_vm14 = vcmp.eq.s32.totalorder %v345_v0, 511 }
  0xcc   : > { %v460_v63 = vmul.f32 %v428_v41, %v768_v47  ;;  %632 = vrcp.f32 %v262_v60  ;;  %vm378_vm2 = vcmp.eq.s32.totalorder %v346_v51, 511 }
  0xcd   : > { %v621_v22 = vpop.eup %620  ;;  %493 = vst.msk [vmem:[%s867_s16 + $0x88] sm:$0xff] %vm184_vm0, %v461_v1  ;;  %634 = vrcp.f32 %v259_v62  ;;  %vm376_vm15 = vcmp.eq.s32.totalorder %v344_v40, 511 }
  0xce   : > { %v623_v10 = vpop.eup %622  ;;  %492 = vst.msk [vmem:[%s867_s16 + $0x80] sm:$0xff] %vm184_vm0, %v460_v63  ;;  %v431_v46 = vsel %vm367_vm4, 1.0, %v621_v22 }
  0xcf   : > { %v463_v47 = vmul.f32 %v431_v46, %v775_v52  ;;  %v430_v23 = vsel %vm366_vm5, 1.0, %v623_v10  ;;  %v268_v15 = vpop.xlane.xlu1 %267  ;;  %v265_v6 = vpop.xlane.xlu0 %264 }
  0xd0   : > { %v462_v18 = vmul.f32 %v430_v23, %v778_v53  ;;  %636 = vrcp.f32 %v268_v15 }
  0xd1   : > { %v625_v24 = vpop.eup %624  ;;  %495 = vst.msk [vmem:[%s867_s16 + $0x98] sm:$0xff] %vm184_vm0, %v463_v47  ;;  %638 = vrcp.f32 %v265_v6 }
  0xd2   : > { %v627_v25 = vpop.eup %626  ;;  %494 = vst.msk [vmem:[%s867_s16 + $0x90] sm:$0xff] %vm184_vm0, %v462_v18  ;;  %v433_v52 = vsel %vm369_vm6, 1.0, %v625_v24 }
  0xd3   : > { %v465_v53 = vmul.f32 %v433_v52, %v785_v58  ;;  %v432_v29 = vsel %vm368_vm7, 1.0, %v627_v25  ;;  %v274_v32 = vpop.xlane.xlu1 %273  ;;  %v271_v33 = vpop.xlane.xlu0 %270 }
  0xd4   : > { %v464_v7 = vmul.f32 %v432_v29, %v788_v59  ;;  %640 = vrcp.f32 %v274_v32 }
  0xd5   : > { %v629_v8 = vpop.eup %628  ;;  %497 = vst.msk [vmem:[%s867_s16 + $0xa8] sm:$0xff] %vm184_vm0, %v465_v53  ;;  %642 = vrcp.f32 %v271_v33 }
  0xd6   : > { %v631_v37 = vpop.eup %630  ;;  %496 = vst.msk [vmem:[%s867_s16 + $0xa0] sm:$0xff] %vm184_vm0, %v464_v7  ;;  %v435_v58 = vsel %vm371_vm8, 1.0, %v629_v8 }
  0xd7   : > { %v467_v43 = vmul.f32 %v435_v58, %v795_v3  ;;  %v434_v59 = vsel %vm370_vm9, 1.0, %v631_v37  ;;  %v280_v44 = vpop.xlane.xlu1 %279  ;;  %v277_v45 = vpop.xlane.xlu0 %276 }
  0xd8   : > { %v466_v35 = vmul.f32 %v434_v59, %v798_v4  ;;  %644 = vrcp.f32 %v280_v44 }
  0xd9   : > { %v633_v50 = vpop.eup %632  ;;  %499 = vst.msk [vmem:[%s867_s16 + $0xb8] sm:$0xff] %vm184_vm0, %v467_v43  ;;  %646 = vrcp.f32 %v277_v45 }
  0xda   : > { %v635_v3 = vpop.eup %634  ;;  %498 = vst.msk [vmem:[%s867_s16 + $0xb0] sm:$0xff] %vm184_vm0, %v466_v35  ;;  %v437_v54 = vsel %vm373_vm10, 1.0, %v633_v50 }
  0xdb   : > { %v469_v16 = vmul.f32 %v437_v54, %v805_v12  ;;  %v436_v4 = vsel %vm372_vm11, 1.0, %v635_v3 }
  0xdc   : > { %v468_v17 = vmul.f32 %v436_v4, %v808_v13  ;;  %v347_v13 = vadd.s32 %v851_v61, %v314_v55 }
  0xdd   : > { %v637_v1 = vpop.eup %636  ;;  %501 = vst.msk [vmem:[%s867_s16 + $0xc8] sm:$0xff] %vm184_vm0, %v469_v16 }
  0xde   : > { %v639_v41 = vpop.eup %638  ;;  %500 = vst.msk [vmem:[%s867_s16 + $0xc0] sm:$0xff] %vm184_vm0, %v468_v17  ;;  %v439_v12 = vsel %vm375_vm12, 1.0, %v637_v1  ;;  %vm379_vm1 = vcmp.eq.s32.totalorder %v347_v13, 511 }
  0xdf   : > { %v471_v57 = vmul.f32 %v439_v12, %v815_v20  ;;  %v438_v60 = vsel %vm374_vm13, 1.0, %v639_v41 }
  0xe0   : > { %v470_v62 = vmul.f32 %v438_v60, %v818_v21 }
  0xe1   : > { %v641_v63 = vpop.eup %640  ;;  %503 = vst.msk [vmem:[%s867_s16 + $0xd8] sm:$0xff] %vm184_vm0, %v471_v57 }
  0xe2   : > { %v643_v5 = vpop.eup %642  ;;  %502 = vst.msk [vmem:[%s867_s16 + $0xd0] sm:$0xff] %vm184_vm0, %v470_v62  ;;  %v441_v20 = vsel %vm377_vm14, 1.0, %v641_v63 }
  0xe3   : > { %v473_v9 = vmul.f32 %v441_v20, %v825_v30  ;;  %v440_v22 = vsel %vm376_vm15, 1.0, %v643_v5 }
  0xe4   : > { %v472_v10 = vmul.f32 %v440_v22, %v828_v31 }
  0xe5   : > { %v645_v21 = vpop.eup %644  ;;  %505 = vst.msk [vmem:[%s867_s16 + $0xe8] sm:$0xff] %vm184_vm0, %v473_v9 }
  0xe6   : > { %v647_v61 = vpop.eup %646  ;;  %504 = vst.msk [vmem:[%s867_s16 + $0xe0] sm:$0xff] %vm184_vm0, %v472_v10  ;;  %v443_v46 = vsel %vm379_vm1, 1.0, %v645_v21 }
  0xe7   : > { %v475_v11 = vmul.f32 %v443_v46, %v835_v38  ;;  %v442_v47 = vsel %vm378_vm2, 1.0, %v647_v61 }
  0xe8   : > { %v474_v23 = vmul.f32 %v442_v47, %v838_v39 }
  0xe9   : > { %507 = vst.msk [vmem:[%s867_s16 + $0xf8] sm:$0xff] %vm184_vm0, %v475_v11 }
  0xea   : > { %506 = vst.msk [vmem:[%s867_s16 + $0xf0] sm:$0xff] %vm184_vm0, %v474_v23 }
  0xeb PF: > { %s11_s6 = sadd.s32 1, %s654_s6  }
  0xec   : > { %p8_p4 = scmp.ge.s32.totalorder %s11_s6, 4  }
  0xee   :  { %10 = sbr.rel (!%p8_p4) target bundleno = 1 (0x1), region = 54 }

</bundles_post_ra>
